<compile_context>
chip_gen: v7x
topology: tpu7x:2x2x1
jax: 0.10.0
libtpu: 0.0.40
codegen_flags: <defaults>
</compile_context>

<pallas_src>
import math

import jax
import jax.numpy as jnp
from jax.experimental import pallas as pl
from jax.experimental.pallas import tpu as pltpu


def _round_up(v, m):
    return (v + m - 1) // m * m


_TILE_BUDGET = 4 * 1024 * 1024   # target bytes for one (in + out) tile
_SPLIT_BYTES = 1 * 1024 * 1024   # force >=2 grid steps above this (v7x: 2 TCs)


# ---------------------------------------------------------------------------
# Kernels
# ---------------------------------------------------------------------------

def _one_hot_lane_kernel(x_ref, o_ref):
    """Fast 2-D path: class axis folded into the lane axis.

    x_ref: (TP, C) int32 labels.
    o_ref: (TP, TL*C) output; lane j encodes (class = j // C, post = j % C).
    Used when C == 1 (class axis *is* the lane axis) or C % 128 == 0
    (each class occupies a lane-aligned slab of width C).
    """
    C = x_ref.shape[1]
    W = o_ref.shape[1]
    TL = W // C
    l0 = pl.program_id(1) * TL
    x = x_ref[...]
    if C == 1:
        # Classes live directly on lanes: one broadcast compare.
        cls = l0 + jax.lax.broadcasted_iota(jnp.int32, (1, W), 1)
        o_ref[...] = (x == cls).astype(o_ref.dtype)          # (TP,1) vs (1,W)
    else:
        # Per-class, lane-aligned slab stores.  TL is kept small by the
        # planner so this static unroll stays cheap; the kernel is
        # HBM-write-bound so the compare/cast compute has huge slack.
        for l in range(TL):
            o_ref[:, l * C:(l + 1) * C] = (x == (l0 + l)).astype(o_ref.dtype)


def _one_hot_3d_kernel(x_ref, o_ref):
    """General fallback: (TP, TL, C) block, lane axis = C (kept whole)."""
    tl = o_ref.shape[1]
    l0 = pl.program_id(1) * tl
    cls = l0 + jax.lax.broadcasted_iota(jnp.int32, o_ref.shape, 1)
    o_ref[...] = (x_ref[...][:, None, :] == cls).astype(o_ref.dtype)


# ---------------------------------------------------------------------------
# Tile planning
# ---------------------------------------------------------------------------

def _maybe_split_rows(TP, P, grid_l, total_out_bytes):
    """Ensure >=2 parallel grid steps for large problems (v7x has 2 TCs)."""
    if grid_l == 1 and total_out_bytes >= _SPLIT_BYTES and P >= 16 and TP >= P:
        TP = min(TP, _round_up((P + 1) // 2, 8))
    return TP


def _plan_2d(P, L, C, itemsize):
    """Tiles for the folded-lane (P, L*C) output.  Returns TP, TL, grid, vmem."""
    if C == 1:
        # Lane axis == class axis: keep it whole unless huge, then tile in
        # 128-lane multiples (keeps stores unmasked).
        TL = L
        if L > 128 and 8 * itemsize * L > _TILE_BUDGET:
            TL = max(128, (_TILE_BUDGET // (8 * itemsize)) // 128 * 128)
    else:
        # C % 128 == 0: cap the per-class unroll and lane footprint.  Extra
        # class-grid steps are cheap: the input block index is constant along
        # that axis, so the label tile is DMA'd only once per row tile.
        TL = max(1, min(L, 32, _TILE_BUDGET // (8 * itemsize * C)))

    W = TL * C
    in_row = 4 * max(C, 128)                 # int32 labels, lane-padded VMEM
    out_row = itemsize * _round_up(W, 128)
    tp_cap = max(1, _TILE_BUDGET // (in_row + out_row))
    TP = P if P <= tp_cap else max(8, tp_cap // 8 * 8)

    grid_l = pl.cdiv(L, TL)
    TP = _maybe_split_rows(TP, P, grid_l, P * L * C * itemsize)
    grid = (pl.cdiv(P, TP), grid_l)

    # Double-buffered footprint -> VMEM limit (plus margin).
    in_vmem = _round_up(TP, 8) * in_row
    out_vmem = _round_up(TP, 8) * out_row
    vmem_limit = max(2 * (in_vmem + out_vmem) + (4 << 20), 16 << 20)
    return TP, TL, grid, vmem_limit


def _plan_3d(P, L, C, itemsize):
    """Tiles for the general (P, L, C) output.  Returns TP, TL, grid, vmem."""
    TL = L
    if L > 8 and 8 * (4 * C + itemsize * L * C) > _TILE_BUDGET:
        TL = max(8, min(L, _TILE_BUDGET // (8 * itemsize * C)) // 8 * 8)

    in_row = 4 * max(C, 128)
    out_row = itemsize * _round_up(TL, 8) * _round_up(C, 128)
    tp_cap = max(1, _TILE_BUDGET // (in_row + out_row))
    TP = P if P <= tp_cap else max(8, tp_cap // 8 * 8)

    grid_l = pl.cdiv(L, TL)
    TP = _maybe_split_rows(TP, P, grid_l, P * L * C * itemsize)
    grid = (pl.cdiv(P, TP), grid_l)

    in_vmem = _round_up(TP, 8) * in_row
    out_vmem = _round_up(TP, 8) * out_row
    vmem_limit = max(2 * (in_vmem + out_vmem) + (4 << 20), 16 << 20)
    return TP, TL, grid, vmem_limit


# ---------------------------------------------------------------------------
# Wrapper
# ---------------------------------------------------------------------------

def one_hot_pallas(x, L, Ldim=1, dtype=jnp.float32):
    """Pallas equivalent of the PyTorch one_hot(x, L, Ldim)."""
    assert Ldim >= 0 or Ldim == -1, f"Only supporting Ldim >= 0 or Ldim == -1: {Ldim}"
    orig_shape = tuple(x.shape)
    dest = x.ndim if Ldim == -1 else Ldim
    assert dest <= x.ndim, (orig_shape, Ldim)

    pre = orig_shape[:dest]          # dims before the inserted class axis
    post = orig_shape[dest:]         # dims after the inserted class axis
    P = math.prod(pre)               # rows (sublane / grid axis)
    C = math.prod(post)              # trailing flatten (lane axis)
    itemsize = jnp.dtype(dtype).itemsize

    x2 = x.reshape(P, C).astype(jnp.int32)

    if C == 1 or C % 128 == 0:
        # Fast path: fold the class axis into the lane axis -> lane-dense
        # stores and a flat (P, L*C) slab with the final element order.
        TP, TL, grid, vmem_limit = _plan_2d(P, L, C, itemsize)
        oh = pl.pallas_call(
            _one_hot_lane_kernel,
            grid=grid,
            in_specs=[pl.BlockSpec((TP, C), lambda p, l: (p, 0))],
            out_specs=pl.BlockSpec((TP, TL * C), lambda p, l: (p, l)),
            out_shape=jax.ShapeDtypeStruct((P, L * C), dtype),
            compiler_params=pltpu.CompilerParams(
                dimension_semantics=("parallel", "parallel"),
                vmem_limit_bytes=vmem_limit,
            ),
        )(x2)
    else:
        # General fallback: keep the lane axis = C, class axis on sublanes.
        TP, TL, grid, vmem_limit = _plan_3d(P, L, C, itemsize)
        oh = pl.pallas_call(
            _one_hot_3d_kernel,
            grid=grid,
            in_specs=[pl.BlockSpec((TP, C), lambda p, l: (p, 0))],
            out_specs=pl.BlockSpec((TP, TL, C), lambda p, l: (p, l, 0)),
            out_shape=jax.ShapeDtypeStruct((P, L, C), dtype),
            compiler_params=pltpu.CompilerParams(
                dimension_semantics=("parallel", "parallel"),
                vmem_limit_bytes=vmem_limit,
            ),
        )(x2)

    # The flat slab already has the final (pre..., L, post...) element order;
    # this reshape is metadata-only over that order (see TODO at top re HLO).
    return oh.reshape(pre + (L,) + post)


class OneHot:
    """Mirror of the PyTorch module (no parameters)."""

    def __init__(self, L, Ldim=1, dtype=jnp.float32):
        self.L = L
        self.Ldim = Ldim
        self.dtype = dtype

    def __call__(self, x):
        return one_hot_pallas(x, self.L, self.Ldim, self.dtype)


if __name__ == "__main__":
    key = jax.random.PRNGKey(0)
    L = 4
    # x: (N=2, d1=16, d2=16) int labels in [0, L)
    x = jax.random.randint(key, (2, 16, 16), 0, L, dtype=jnp.int32)

    # Ldim=1: C = 16*16 = 256 (multiple of 128) -> folded-lane 2-D path.
    out = jax.block_until_ready(OneHot(L=L, Ldim=1)(x))
    ref = jax.nn.one_hot(x, L, axis=1, dtype=jnp.float32)
    assert out.shape == (2, L, 16, 16), out.shape
    assert out.dtype == jnp.float32, out.dtype
    assert bool(jnp.all(out == ref)), "mismatch vs reference one-hot (Ldim=1)"

    # Ldim=-1: C = 1 -> 2-D (P, L) path with the class axis on lanes.
    out2 = jax.block_until_ready(OneHot(L=L, Ldim=-1)(x))
    ref2 = jax.nn.one_hot(x, L, axis=-1, dtype=jnp.float32)
    assert out2.shape == (2, 16, 16, L), out2.shape
    assert bool(jnp.all(out2 == ref2)), "mismatch vs reference one-hot (Ldim=-1)"

    # General fallback path: C = 16*10 = 160 (neither 1 nor a multiple of 128).
    x3 = jax.random.randint(key, (2, 16, 10), 0, L, dtype=jnp.int32)
    out3 = jax.block_until_ready(OneHot(L=L, Ldim=1)(x3))
    ref3 = jax.nn.one_hot(x3, L, axis=1, dtype=jnp.float32)
    assert out3.shape == (2, L, 16, 10), out3.shape
    assert bool(jnp.all(out3 == ref3)), "mismatch vs reference one-hot (fallback)"

    print("KERNEL_OK")
</pallas_src>

<mosaic_0001>
module attributes {stable_mosaic.version = 11 : i64} {
  func.func @_one_hot_lane_kernel(%arg0: i32, %arg1: i32, %arg2: memref<2x256xi32, #tpu.memory_space<vmem>>, %arg3: memref<2x1024xf32, #tpu.memory_space<vmem>>) attributes {dimension_semantics = [#tpu.dimension_semantics<parallel>, #tpu.dimension_semantics<parallel>], iteration_bounds = array<i64: 1, 1>, scalar_prefetch = 0 : i64, scratch_operands = 0 : i64, tpu.core_type = #tpu.core_type<tc>, window_params = [{transform_indices = @transform_0, window_bounds = array<i64: 2, 256>}, {transform_indices = @transform_1, window_bounds = array<i64: 2, 1024>}]} {
    %c4_i32 = arith.constant 4 : i32
    %0 = arith.muli %arg1, %c4_i32 : i32
    %c0 = arith.constant 0 : index
    %c0_0 = arith.constant 0 : index
    %1 = vector.load %arg2[%c0, %c0_0] : memref<2x256xi32, #tpu.memory_space<vmem>>, vector<2x256xi32>
    %c0_i32 = arith.constant 0 : i32
    %2 = arith.addi %0, %c0_i32 : i32
    %3 = vector.broadcast %2 : i32 to vector<2x256xi32>
    %4 = arith.cmpi eq, %1, %3 : vector<2x256xi32>
    %5 = arith.extui %4 : vector<2x256xi1> to vector<2x256xi32>
    %6 = arith.sitofp %5 : vector<2x256xi32> to vector<2x256xf32>
    %c0_1 = arith.constant 0 : index
    %c0_2 = arith.constant 0 : index
    %7 = vector.load %arg3[%c0_1, %c0_2] : memref<2x1024xf32, #tpu.memory_space<vmem>>, vector<2x256xf32>
    tpu.vector_store %arg3[%c0_1, %c0_2], %6 {strides = array<i32>} : memref<2x1024xf32, #tpu.memory_space<vmem>>, vector<2x256xf32>,
    %c1_i32 = arith.constant 1 : i32
    %8 = arith.addi %0, %c1_i32 : i32
    %9 = vector.broadcast %8 : i32 to vector<2x256xi32>
    %10 = arith.cmpi eq, %1, %9 : vector<2x256xi32>
    %11 = arith.extui %10 : vector<2x256xi1> to vector<2x256xi32>
    %12 = arith.sitofp %11 : vector<2x256xi32> to vector<2x256xf32>
    %c0_3 = arith.constant 0 : index
    %c256 = arith.constant 256 : index
    %13 = vector.load %arg3[%c0_3, %c256] : memref<2x1024xf32, #tpu.memory_space<vmem>>, vector<2x256xf32>
    tpu.vector_store %arg3[%c0_3, %c256], %12 {strides = array<i32>} : memref<2x1024xf32, #tpu.memory_space<vmem>>, vector<2x256xf32>,
    %c2_i32 = arith.constant 2 : i32
    %14 = arith.addi %0, %c2_i32 : i32
    %15 = vector.broadcast %14 : i32 to vector<2x256xi32>
    %16 = arith.cmpi eq, %1, %15 : vector<2x256xi32>
    %17 = arith.extui %16 : vector<2x256xi1> to vector<2x256xi32>
    %18 = arith.sitofp %17 : vector<2x256xi32> to vector<2x256xf32>
    %c0_4 = arith.constant 0 : index
    %c512 = arith.constant 512 : index
    %19 = vector.load %arg3[%c0_4, %c512] : memref<2x1024xf32, #tpu.memory_space<vmem>>, vector<2x256xf32>
    tpu.vector_store %arg3[%c0_4, %c512], %18 {strides = array<i32>} : memref<2x1024xf32, #tpu.memory_space<vmem>>, vector<2x256xf32>,
    %c3_i32 = arith.constant 3 : i32
    %20 = arith.addi %0, %c3_i32 : i32
    %21 = vector.broadcast %20 : i32 to vector<2x256xi32>
    %22 = arith.cmpi eq, %1, %21 : vector<2x256xi32>
    %23 = arith.extui %22 : vector<2x256xi1> to vector<2x256xi32>
    %24 = arith.sitofp %23 : vector<2x256xi32> to vector<2x256xf32>
    %c0_5 = arith.constant 0 : index
    %c768 = arith.constant 768 : index
    %25 = vector.load %arg3[%c0_5, %c768] : memref<2x1024xf32, #tpu.memory_space<vmem>>, vector<2x256xf32>
    tpu.vector_store %arg3[%c0_5, %c768], %24 {strides = array<i32>} : memref<2x1024xf32, #tpu.memory_space<vmem>>, vector<2x256xf32>,
    return
  }
  func.func @transform_0(%arg0: i32, %arg1: i32) -> (i32, i32) {
    %c0_i32 = arith.constant 0 : i32
    %c0_i32_0 = arith.constant 0 : i32
    return %arg0, %c0_i32 : i32, i32
  }
  func.func @transform_1(%arg0: i32, %arg1: i32) -> (i32, i32) {
    %c0_i32 = arith.constant 0 : i32
    return %arg0, %arg1 : i32, i32
  }
}

</mosaic_0001>

<bundles_post_ra>
// kernel: tpu_custom_call.1
= control target key start
LH: loop header
LB: loop body
LE: loop exit
PB: predicated region body
PF: predicated region fallthrough
CT: control target
= control target key end

     0   :  { %6 = vsyncpa [#allocation3], 0  ;;  %s153_s0 = inlined_call_operand.hbm [shape: s32[2,256], index: 0, kind: input, shape index: {}]   ;;  %s154_s1 = inlined_call_operand.hbm [shape: f32[2,1024], index: 1, kind: output, shape index: {}]  }
   0x1   :  { %7 = vsyncpa [#allocation4], 0  ;;  %s116_s6 = smov [#allocation2]   ;;  %s68_s10 = scalar_lea.hbm %s153_s0, 64 }
   0x2   :  { %s14_s7 = sshll.u32 %s116_s6, 4  ;;  %p69_p0 = scmp.ne.s32.totalorder %s153_s0, %s68_s10  ;;  %s15_s7 = int_to_ptr.vmem [resolvable:$true] %s14_s7 }
   0x3   :  { %p72_p1 = scmp.lt.u32.totalorder %s68_s10, %s153_s0 }
   0x5   :  { %p74_p2 = pnand %p72_p1, %p69_p0 }
   0x7   :  { %77 = shalt.err (!%p74_p2)
}
   0x8   :  { %s78_s15 = scalar_lea.vmem %s15_s7, 64  ;;  %p83_p4 = scmp.lt.s32.totalorder %s15_s7, %s15_s7 }
   0x9   :  { %p79_p3 = scmp.ne.s32.totalorder %s15_s7, %s78_s15  ;;  %p84_p5 = scmp.lt.s32.totalorder %s78_s15, %s78_s15 }
   0xb   :  { %p85_p6 = por %p84_p5, %p83_p4 }
   0xd   :  { %p86_p7 = pnand %p85_p6, %p79_p3 }
   0xf   :  { %89 = shalt.err (!%p86_p7)
}
  0x10   :  { %17 = dma.hbm_to_vmem [thread:$0]  %s153_s0, 64, %s15_s7, [#allocation3]  }
  0x11   :  { %112 = dma.done.wait [#allocation3], 64  }
  0x12   :  { %113 = vsyncadd [#allocation3], 4294967232  ;;  %s117_s18 = smov [#allocation5]   ;;  %v22_v0 = vld [vmem:[#allocation2] sm:$0xf]  ;;  %v118_v1 = vmov 0.0  }
  0x13   :  { %s52_s19 = sshll.u32 %s117_s18, 4  ;;  %vm24_vm0 = vcmp.eq.s32.totalorder %v22_v0, 0  ;;  %vm30_vm1 = vcmp.eq.s32.totalorder %v22_v0, 1  ;;  %vm36_vm2 = vcmp.eq.s32.totalorder %v22_v0, 2  ;;  %vm42_vm3 = vcmp.eq.s32.totalorder %v22_v0, 3  ;;  %s53_s19 = int_to_ptr.vmem [resolvable:$true] %s52_s19 }
  0x14   :  { %v61_v2 = vsel %vm24_vm0, 1.0, %v118_v1  ;;  %v62_v3 = vsel %vm30_vm1, 1.0, %v118_v1  ;;  %v63_v4 = vsel %vm36_vm2, 1.0, %v118_v1  ;;  %v64_v5 = vsel %vm42_vm3, 1.0, %v118_v1  ;;  %s90_s0 = scalar_lea.vmem %s53_s19, 256  ;;  %p95_p9 = scmp.lt.s32.totalorder %s53_s19, %s53_s19 }
  0x15   :  { %27 = vst [vmem:[#allocation5] sm:$0xf] %v61_v2  ;;  %33 = vst [vmem:[#allocation5 + $0x4] sm:$0xf] %v62_v3  ;;  %p91_p8 = scmp.ne.s32.totalorder %s53_s19, %s90_s0  ;;  %p96_p10 = scmp.lt.s32.totalorder %s90_s0, %s90_s0 }
  0x16   :  { %39 = vst [vmem:[#allocation5 + $0x8] sm:$0xf] %v63_v4  ;;  %45 = vst [vmem:[#allocation5 + $0xc] sm:$0xf] %v64_v5 }
  0x17   :  { %p97_p11 = por %p96_p10, %p95_p9 }
  0x19   :  { %p98_p12 = pnand %p97_p11, %p91_p8 }
  0x1b   :  { %101 = shalt.err (!%p98_p12)
}
  0x1c   :  { %s102_s22 = scalar_lea.hbm %s154_s1, 256 }
  0x1d   :  { %p103_p13 = scmp.ne.s32.totalorder %s154_s1, %s102_s22  ;;  %p106_p0 = scmp.lt.u32.totalorder %s102_s22, %s154_s1 }
  0x1f   :  { %p108_p1 = pnand %p106_p0, %p103_p13 }
  0x21   :  { %111 = shalt.err (!%p108_p1)
}
  0x22   :  { %55 = dma.vmem_to_hbm [thread:$0]  %s53_s19, 256, %s154_s1, [#allocation4]  }
  0x23   :  { %114 = dma.done.wait [#allocation4], 256  }
  0x24   :  { %115 = vsyncadd [#allocation4], 4294967040 }
  0x25   :  { %59 = vsyncpa [#allocation3], 1 }
  0x26   :  { %60 = vsyncpa [#allocation4], 1 }

</bundles_post_ra>
